<compile_context>
chip_gen: v5e
topology: v5e:2x2
jax: 0.10.0
libtpu: 0.0.40
codegen_flags: <defaults>
</compile_context>

<pallas_src>
import functools
import math

import jax
import jax.numpy as jnp
from jax.experimental import pallas as pl
from jax.experimental.pallas import tpu as pltpu


def _round_up(n, m):
    return ((n + m - 1) // m) * m


def _xlogx(v):
    v = float(v)
    return v * math.log(v) if v > 0.0 else 0.0


def _label_smoothing_kernel(x_ref, tgt_ref, partial_ref, acc_ref, *,
                            smooth_val, confidence, padding_idx, tile_v):
    kv = pl.program_id(1)
    n_kv = pl.num_programs(1)

    @pl.when(kv == 0)
    def _init():
        acc_ref[...] = jnp.zeros_like(acc_ref)

    x = x_ref[...].astype(jnp.float32)          # (TILE_M, TILE_V) tile of log-probs
    tgt = tgt_ref[...]                          # (TILE_M, 1) int32 class indices

    tm, tv = x.shape
    # Global column index for this vocab tile.
    col = jax.lax.broadcasted_iota(jnp.int32, (tm, tv), 1) + kv * tile_v

    # sum(true_dist * x) for this tile, decomposed (no true_dist materialization):
    row_sum = jnp.sum(x, axis=1, keepdims=True)                                  # (TILE_M, 1)
    x_tgt = jnp.sum(jnp.where(col == tgt, x, 0.0), axis=1, keepdims=True)        # x[i, target_i]

    row_tx = smooth_val * row_sum + (confidence - smooth_val) * x_tgt
    if padding_idx is not None:
        x_pad = jnp.sum(jnp.where(col == padding_idx, x, 0.0), axis=1, keepdims=True)
        row_tx = row_tx - smooth_val * x_pad
        # rows whose target is padding_idx contribute nothing
        row_tx = jnp.where(tgt == padding_idx, 0.0, row_tx)

    acc_ref[...] += row_tx

    @pl.when(kv == n_kv - 1)
    def _finish():
        partial_ref[0, 0] = jnp.sum(acc_ref[...])


def label_smoothing_loss(x, target, *, padding_idx=None, label_smoothing=0.1,
                         tile_m=256, tile_v=2048):
    """x: (N, V) log-probabilities (any float dtype); target: (N,) int.

    Returns the scalar summed KL-divergence loss (float32).
    """
    n_rows, n_classes = x.shape
    assert n_classes > 2, "label smoothing requires V > 2 (smoothing / (V - 2))"
    confidence = 1.0 - label_smoothing
    smooth_val = label_smoothing / (n_classes - 2)

    # Constant sum(t * log t) term, per valid (non-padding) row — host-side closed form.
    if padding_idx is None:
        per_row_c = _xlogx(confidence) + (n_classes - 1) * _xlogx(smooth_val)
        num_valid = jnp.float32(n_rows)
    else:
        per_row_c = _xlogx(confidence) + (n_classes - 2) * _xlogx(smooth_val)
        num_valid = jnp.sum(target != padding_idx).astype(jnp.float32)

    # Tile sizes: clamp to (padded) problem size; keep lane/sublane alignment.
    tile_m = min(tile_m, _round_up(n_rows, 8))
    tile_v = min(tile_v, _round_up(n_classes, 128))
    n_pad = _round_up(n_rows, tile_m)
    v_pad = _round_up(n_classes, tile_v)

    tgt = target.astype(jnp.int32).reshape(n_rows, 1)
    pad_tgt_val = padding_idx if padding_idx is not None else 0
    if n_pad != n_rows:
        tgt = jnp.pad(tgt, ((0, n_pad - n_rows), (0, 0)), constant_values=pad_tgt_val)
    if n_pad != n_rows or v_pad != n_classes:
        # Zero-padded rows/cols contribute exactly zero to the decomposed sum.
        x = jnp.pad(x, ((0, n_pad - n_rows), (0, v_pad - n_classes)))

    num_row_tiles = n_pad // tile_m
    num_v_tiles = v_pad // tile_v

    kernel = functools.partial(
        _label_smoothing_kernel,
        smooth_val=float(smooth_val),
        confidence=float(confidence),
        padding_idx=padding_idx,
        tile_v=tile_v,
    )

    partials = pl.pallas_call(
        kernel,
        out_shape=jax.ShapeDtypeStruct((num_row_tiles, 1), jnp.float32),
        grid=(num_row_tiles, num_v_tiles),
        in_specs=[
            pl.BlockSpec((tile_m, tile_v), lambda i, k: (i, k)),   # x tile (native dtype)
            pl.BlockSpec((tile_m, 1), lambda i, k: (i, 0)),        # target, reused over vocab tiles
        ],
        out_specs=pl.BlockSpec((1, 1), lambda i, k: (i, 0),
                               memory_space=pltpu.SMEM),
        scratch_shapes=[pltpu.VMEM((tile_m, 1), jnp.float32)],
        compiler_params=pltpu.CompilerParams(
            dimension_semantics=("parallel", "arbitrary"),
            vmem_limit_bytes=32 * 1024 * 1024,
        ),
        cost_estimate=pl.CostEstimate(
            flops=2 * n_rows * n_classes,
            transcendentals=0,
            bytes_accessed=n_rows * n_classes * x.dtype.itemsize,
        ),
    )(x, tgt)

    return num_valid * jnp.float32(per_row_c) - jnp.sum(partials)


def _reference(x, target, padding_idx, label_smoothing):
    n_rows, n_classes = x.shape
    confidence = 1.0 - label_smoothing
    smooth_val = label_smoothing / (n_classes - 2)
    x = x.astype(jnp.float32)
    true_dist = jnp.full((n_rows, n_classes), smooth_val, dtype=jnp.float32)
    true_dist = true_dist.at[jnp.arange(n_rows), target].set(confidence)
    if padding_idx is not None:
        true_dist = true_dist.at[:, padding_idx].set(0.0)
        row_mask = (target == padding_idx)[:, None]
        true_dist = jnp.where(row_mask, 0.0, true_dist)
    safe_t = jnp.maximum(true_dist, 1e-30)
    kl = jnp.where(true_dist > 0.0, true_dist * (jnp.log(safe_t) - x), 0.0)
    return jnp.sum(kl)


if __name__ == "__main__":
    key = jax.random.PRNGKey(0)
    label_smoothing = 0.1

    # --- case 1: small shape, padding_idx set (exercises padding path) ---
    N, V, padding_idx = 8, 32, 0
    k1, k2, k3, k4 = jax.random.split(key, 4)
    x1 = jax.nn.log_softmax(jax.random.normal(k1, (N, V), dtype=jnp.float32), axis=-1)
    t1 = jax.random.randint(k2, (N,), 0, V, dtype=jnp.int32)
    t1 = t1.at[3].set(padding_idx)

    loss1 = jax.block_until_ready(
        label_smoothing_loss(x1, t1, padding_idx=padding_idx,
                             label_smoothing=label_smoothing))
    ref1 = _reference(x1, t1, padding_idx, label_smoothing)
    assert jnp.allclose(loss1, ref1, rtol=1e-5, atol=1e-5), (loss1, ref1)

    # --- case 2: multi-tile grid (2 row tiles x 3 vocab tiles), no padding_idx ---
    N2, V2 = 16, 384
    x2 = jax.nn.log_softmax(jax.random.normal(k3, (N2, V2), dtype=jnp.float32), axis=-1)
    t2 = jax.random.randint(k4, (N2,), 0, V2, dtype=jnp.int32)

    loss2 = jax.block_until_ready(
        label_smoothing_loss(x2, t2, padding_idx=None,
                             label_smoothing=label_smoothing,
                             tile_m=8, tile_v=128))
    ref2 = _reference(x2, t2, None, label_smoothing)
    assert jnp.allclose(loss2, ref2, rtol=1e-5, atol=1e-5), (loss2, ref2)

    # TODO(synk): the PyTorch module also caches self.true_dist; not materialized here
    # (the loss never needs the full (N, V) smoothed distribution).
    print("KERNEL_OK")
</pallas_src>

<mosaic_0001>
module attributes {stable_mosaic.version = 11 : i64} {
  func.func @_label_smoothing_kernel(%arg0: i32, %arg1: i32, %arg2: memref<8x128xf32, #tpu.memory_space<vmem>>, %arg3: memref<8x1xi32, #tpu.memory_space<vmem>>, %arg4: memref<1x1xf32, #tpu.memory_space<smem>>, %arg5: memref<8x1xf32, #tpu.memory_space<vmem>>) attributes {dimension_semantics = [#tpu.dimension_semantics<parallel>, #tpu.dimension_semantics<arbitrary>], iteration_bounds = array<i64: 1, 1>, scalar_prefetch = 0 : i64, scratch_operands = 1 : i64, tpu.core_type = #tpu.core_type<tc>, window_params = [{transform_indices = @transform_0, window_bounds = array<i64: 8, 128>}, {transform_indices = @transform_1, window_bounds = array<i64: 8, 1>}, {transform_indices = @transform_2, window_bounds = array<i64: 1, 1>}]} {
    %c0_i32 = arith.constant 0 : i32
    %0 = arith.cmpi eq, %arg1, %c0_i32 : i32
    %1 = arith.extui %0 : i1 to i32
    %c0_i32_0 = arith.constant 0 : i32
    %2 = arith.cmpi ne, %1, %c0_i32_0 : i32
    scf.if %2 {
      %cst_20 = arith.constant 0.000000e+00 : f32
      %41 = vector.broadcast %cst_20 : f32 to vector<8x1xf32>
      %c0_21 = arith.constant 0 : index
      %c0_22 = arith.constant 0 : index
      %42 = vector.load %arg5[%c0_21, %c0_22] : memref<8x1xf32, #tpu.memory_space<vmem>>, vector<8x1xf32>
      tpu.vector_store %arg5[%c0_21, %c0_22], %41 {strides = array<i32>} : memref<8x1xf32, #tpu.memory_space<vmem>>, vector<8x1xf32>,
    } else {
    }
    %c0 = arith.constant 0 : index
    %c0_1 = arith.constant 0 : index
    %3 = vector.load %arg2[%c0, %c0_1] : memref<8x128xf32, #tpu.memory_space<vmem>>, vector<8x128xf32>
    %c0_2 = arith.constant 0 : index
    %c0_3 = arith.constant 0 : index
    %4 = vector.load %arg3[%c0_2, %c0_3] : memref<8x1xi32, #tpu.memory_space<vmem>>, vector<8x1xi32>
    %5 = tpu.iota {dimensions = array<i32: 1>} : vector<8x128xi32>
    %c128_i32 = arith.constant 128 : i32
    %6 = arith.muli %arg1, %c128_i32 : i32
    %7 = vector.broadcast %6 : i32 to vector<8x128xi32>
    %8 = arith.addi %5, %7 : vector<8x128xi32>
    %cst = arith.constant dense<0.000000e+00> : vector<8xf32>
    %9 = vector.multi_reduction <add>, %3, %cst [1] : vector<8x128xf32> to vector<8xf32>
    %10 = vector.shape_cast %9 : vector<8xf32> to vector<8x1xf32>
    %11 = vector.broadcast %4 : vector<8x1xi32> to vector<8x128xi32>
    %12 = arith.cmpi eq, %8, %11 : vector<8x128xi32>
    %cst_4 = arith.constant 0.000000e+00 : f32
    %13 = vector.broadcast %cst_4 : f32 to vector<8x128xf32>
    %14 = arith.select %12, %3, %13 : vector<8x128xi1>, vector<8x128xf32>
    %cst_5 = arith.constant dense<0.000000e+00> : vector<8xf32>
    %15 = vector.multi_reduction <add>, %14, %cst_5 [1] : vector<8x128xf32> to vector<8xf32>
    %16 = vector.shape_cast %15 : vector<8xf32> to vector<8x1xf32>
    %cst_6 = arith.constant 0.00333333341 : f32
    %17 = vector.broadcast %cst_6 : f32 to vector<8x1xf32>
    %18 = arith.mulf %17, %10 : vector<8x1xf32>
    %cst_7 = arith.constant 0.896666646 : f32
    %19 = vector.broadcast %cst_7 : f32 to vector<8x1xf32>
    %20 = arith.mulf %19, %16 : vector<8x1xf32>
    %21 = arith.addf %18, %20 : vector<8x1xf32>
    %c0_i32_8 = arith.constant 0 : i32
    %22 = vector.broadcast %c0_i32_8 : i32 to vector<8x128xi32>
    %23 = arith.cmpi eq, %8, %22 : vector<8x128xi32>
    %cst_9 = arith.constant 0.000000e+00 : f32
    %24 = vector.broadcast %cst_9 : f32 to vector<8x128xf32>
    %25 = arith.select %23, %3, %24 : vector<8x128xi1>, vector<8x128xf32>
    %cst_10 = arith.constant dense<0.000000e+00> : vector<8xf32>
    %26 = vector.multi_reduction <add>, %25, %cst_10 [1] : vector<8x128xf32> to vector<8xf32>
    %27 = vector.shape_cast %26 : vector<8xf32> to vector<8x1xf32>
    %cst_11 = arith.constant 0.00333333341 : f32
    %28 = vector.broadcast %cst_11 : f32 to vector<8x1xf32>
    %29 = arith.mulf %28, %27 : vector<8x1xf32>
    %30 = arith.subf %21, %29 : vector<8x1xf32>
    %c0_i32_12 = arith.constant 0 : i32
    %31 = vector.broadcast %c0_i32_12 : i32 to vector<8x1xi32>
    %32 = arith.cmpi eq, %4, %31 : vector<8x1xi32>
    %cst_13 = arith.constant 0.000000e+00 : f32
    %33 = vector.broadcast %cst_13 : f32 to vector<8x1xf32>
    %34 = arith.select %32, %33, %30 : vector<8x1xi1>, vector<8x1xf32>
    %c0_14 = arith.constant 0 : index
    %c0_15 = arith.constant 0 : index
    %35 = vector.load %arg5[%c0_14, %c0_15] : memref<8x1xf32, #tpu.memory_space<vmem>>, vector<8x1xf32>
    %36 = arith.addf %35, %34 : vector<8x1xf32>
    %c0_16 = arith.constant 0 : index
    %c0_17 = arith.constant 0 : index
    %37 = vector.load %arg5[%c0_16, %c0_17] : memref<8x1xf32, #tpu.memory_space<vmem>>, vector<8x1xf32>
    tpu.vector_store %arg5[%c0_16, %c0_17], %36 {strides = array<i32>} : memref<8x1xf32, #tpu.memory_space<vmem>>, vector<8x1xf32>,
    %c0_i32_18 = arith.constant 0 : i32
    %38 = arith.cmpi eq, %arg1, %c0_i32_18 : i32
    %39 = arith.extui %38 : i1 to i32
    %c0_i32_19 = arith.constant 0 : i32
    %40 = arith.cmpi ne, %39, %c0_i32_19 : i32
    scf.if %40 {
      %c0_20 = arith.constant 0 : index
      %c0_21 = arith.constant 0 : index
      %41 = vector.load %arg5[%c0_20, %c0_21] : memref<8x1xf32, #tpu.memory_space<vmem>>, vector<8x1xf32>
      %42 = vector.shape_cast %41 : vector<8x1xf32> to vector<1x8x1xf32>
      %cst_22 = arith.constant dense<0.000000e+00> : vector<1xf32>
      %43 = vector.multi_reduction <add>, %42, %cst_22 [1, 2] : vector<1x8x1xf32> to vector<1xf32>
      %44 = vector.shape_cast %43 : vector<1xf32> to vector<1x1x1xf32>
      %45 = vector.extract %44[0, 0, 0] : f32 from vector<1x1x1xf32>
      %c0_23 = arith.constant 0 : index
      %c0_24 = arith.constant 0 : index
      %46 = memref.load %arg4[%c0_23, %c0_24] : memref<1x1xf32, #tpu.memory_space<smem>>
      memref.store %45, %arg4[%c0_23, %c0_24] : memref<1x1xf32, #tpu.memory_space<smem>>
    } else {
    }
    return
  }
  func.func @transform_0(%arg0: i32, %arg1: i32) -> (i32, i32) {
    %c0_i32 = arith.constant 0 : i32
    return %arg0, %arg1 : i32, i32
  }
  func.func @transform_1(%arg0: i32, %arg1: i32) -> (i32, i32) {
    %c0_i32 = arith.constant 0 : i32
    %c0_i32_0 = arith.constant 0 : i32
    return %arg0, %c0_i32 : i32, i32
  }
  func.func @transform_2(%arg0: i32, %arg1: i32) -> (i32, i32) {
    %c0_i32 = arith.constant 0 : i32
    %c0_i32_0 = arith.constant 0 : i32
    return %arg0, %c0_i32 : i32, i32
  }
}

</mosaic_0001>

<bundles_post_ra>
// kernel: tpu_custom_call.1
= control target key start
LH: loop header
LB: loop body
LE: loop exit
PB: predicated region body
PF: predicated region fallthrough
CT: control target
= control target key end

     0   :  { %s130_s0 = inlined_call_operand.vmem [shape: f32[8,128], index: 0, kind: input, shape index: {}]   ;;  %s131_s1 = inlined_call_operand.vmem [shape: s32[8,1], index: 1, kind: input, shape index: {}]   ;;  %s132_s2 = inlined_call_operand.hbm [shape: f32[1,1], index: 2, kind: output, shape index: {}]  }
   0x1   :  { %v19_v0 = vld [vmem:[%s131_s1] sm:$0xff] }
   0x2   :  { %7 = vsyncpa [#allocation4], 0  ;;  %v100_v1 = vmov 0   ;;  %v18_v2 = vld [vmem:[%s130_s0] sm:$0xff]  ;;  %v20_v3 = vlaneseq  ;;  %vm16_vm2 = vcmask 7168   ;;  %v101_v8 = vmov 0.0  }
   0x3   :  { %85 = vset.pattern.permute.xlu0 %v100_v1  ;;  %17 = vst.msk [vmem:[#allocation2] sm:$0xff] %vm16_vm2, %v101_v8  ;;  %vm43_vm3 = vcmp.eq.s32.totalorder %v19_v0, 0  ;;  %s70_s13 = sshll.u32 %s132_s2, 4  ;;  %s102_s15 = smov [#allocation3]   ;;  %s71_s13 = int_to_ptr.hbm [resolvable:$true] %s70_s13 }
   0x4   :  { %28 = vperm.xlu0 %85, %v19_v0   ;;  %v21_v4 = vand.u32 127, %v20_v3 }
   0x6   :  { %vm37_vm1 = vcmp.eq.s32.totalorder %v21_v4, 0 }
   0x7   :  { %v38_v7 = vsel %vm37_vm1, %v18_v2, 0.0 }
   0xa   :  { %v45_v17 = vld [vmem:[#allocation2] sm:$0xff] }
  0x2e   :  { %25 = vadd.xlane.f32.xlu0 %v18_v2 }
  0x76   :  { %v29_v5 = vpop.permute.xlu0 %28 }
  0x77   :  { %vm30_vm0 = vcmp.eq.s32.totalorder %v21_v4, %v29_v5 }
  0x78   :  { %v31_v6 = vsel %vm30_vm0, %v18_v2, 0.0 }
  0x79   :  { %32 = vadd.xlane.f32.xlu1 %v31_v6 }
  0x81   :  { %39 = vadd.xlane.f32.xlu1 %v38_v7 }
  0xa1   :  { %v26_v10 = vpop.xlane.xlu0 %25 }
  0xa2   :  { %v34_v11 = vmul.f32 0.0033333334, %v26_v10 }
  0xec   :  { %v33_v9 = vpop.xlane.xlu1 %32 }
  0xed   :  { %v35_v12 = vmul.f32 0.89666665, %v33_v9 }
  0xef   :  { %v36_v14 = vadd.f32 %v35_v12, %v34_v11 }
  0xf4   :  { %v40_v13 = vpop.xlane.xlu1 %39 }
  0xf5   :  { %v41_v15 = vmul.f32 0.0033333334, %v40_v13 }
  0xf7   :  { %v42_v16 = vsub.f32 %v36_v14, %v41_v15 }
  0xf9   :  { %v44_v18 = vsel %vm43_vm3, 0.0, %v42_v16 }
  0xfa   :  { %v46_v19 = vadd.f32 %v45_v17, %v44_v18 }
  0xfc   :  { %48 = vst.msk [vmem:[#allocation2] sm:$0xff] %vm16_vm2, %v46_v19 }
 0x103   :  { %v52_v20 = vld [vmem:[#allocation2] sm:$0xff] }
 0x104   :  { %v53_v21 = vsel %vm16_vm2, %v52_v20, 0.0 }
 0x105   :  { %54 = vadd.xlane.f32.xlu2 %v53_v21 }
 0x178   :  { %v55_v22 = vpop.xlane.xlu2 %54 }
 0x179   :  { %v56_v23 = vrot.slane %v55_v22, 4 }
 0x17b   :  { %v57_v24 = vadd.f32 %v56_v23, %v55_v22 }
 0x17d   :  { %v58_v25 = vrot.slane %v57_v24, 2 }
 0x17f   :  { %v59_v26 = vadd.f32 %v58_v25, %v57_v24 }
 0x181   :  { %v60_v27 = vrot.slane %v59_v26, 1 }
 0x183   :  { %v61_v28 = vadd.f32 %v60_v27, %v59_v26 }
 0x185   :  { %80 = vpush %v61_v28 }
 0x1b6   :  { %s81_s14 = spop %80 }
 0x1b7   :  { %64 = sst [smem:[#allocation3]] %s81_s14 }
 0x1b8   :  { %73 = dma.smem_to_hbm %s102_s15, 16, %s71_s13, [#allocation4]  }
 0x1b9   :  { %98 = dma.done.wait [#allocation4], 16  }
 0x1ba   :  { %99 = vsyncadd [#allocation4], 4294967280 }
 0x1bb   :  { %78 = sfence }
 0x1bc   :  { %79 = vsyncpa [#allocation4], 1 }

</bundles_post_ra>
